<compile_context>
chip_gen: v6e
topology: v6e:2x2x1
jax: 0.10.0
libtpu: 0.0.40
codegen_flags: <defaults>
</compile_context>

<pallas_src>
import jax
import jax.numpy as jnp
from jax.experimental import pallas as pl
from jax.experimental.pallas import tpu as pltpu

LANE = 128
_VMEM_LIMIT = 32 * 1024 * 1024                    # scoped limit requested from Mosaic
_VMEM_BUDGET = _VMEM_LIMIT - 8 * 1024 * 1024      # headroom for compiler-internal scratch


def _round_up(x, m):
    return (x + m - 1) // m * m


def _pick_tile_h(n, h_out, w_out, cin, cout_pad, hp, wp, k_total, fused):
    """Largest h_out divisor whose double-buffered working set fits the VMEM budget,
    preferring MXU-friendly M (>=128, multiple of 256) and >= 4 total grid steps
    (>= 2 steps per v7x TensorCore); batch steps count toward that minimum."""
    bf16 = 2
    resident = 2 * (hp * wp * cin * bf16)           # haloed image (double-buffered)
    resident += 2 * (k_total * cout_pad * bf16)     # weights
    resident += 2 * (2 * cout_pad * 4)              # scale + shift (f32)
    best = None
    for d in range(h_out, 0, -1):
        if h_out % d:
            continue
        m = d * w_out
        tile = 2 * (m * cout_pad * bf16)            # bf16 output tile (double-buffered)
        tile += m * k_total * bf16 if fused else m * cout_pad * 4   # patch / f32 acc
        if resident + tile > _VMEM_BUDGET:
            continue
        steps = n * (h_out // d)
        key = (m >= 128, steps >= 4, m % 256 == 0, d)
        if best is None or key > best[0]:
            best = (key, d)
    if best is None:
        # TODO(synk): even a single output row exceeds the budget; would need W/Cout
        #             tiling as well.  Fall back to one row.
        return 1
    return best[1]


def fused_conv_bn_relu(x_nhwc, conv_w, conv_b, bn_gamma, bn_beta, bn_mean, bn_var,
                       *, padding=1, eps=1e-5):
    """relu(batchnorm(conv2d(x))) — stride 1, square padding, inference-mode BN.

    x_nhwc : (N, H, W, Cin)        any float dtype (kept bf16 internally)
    conv_w : (KH, KW, Cin, Cout)   float32 (HWIO layout)
    conv_b : (Cout,) float32 or None
    returns: (N, H_out, W_out, Cout_pad) bfloat16, NHWC; Cout zero-padded to a multiple
             of 128 for lane-dense stores (channels [Cout:] are exactly zero).
    """
    n, h, w, cin = x_nhwc.shape
    kh_sz, kw_sz, cin_w, cout = conv_w.shape
    if cin != cin_w:
        raise ValueError(f"Cin mismatch: activation {cin} vs weight {cin_w}")
    h_out = h + 2 * padding - kh_sz + 1
    w_out = w + 2 * padding - kw_sz + 1
    hp, wp = h + 2 * padding, w + 2 * padding
    cout_pad = _round_up(cout, LANE)
    n_taps = kh_sz * kw_sz
    k_total = n_taps * cin
    fused = cin < LANE       # fat-K single dot unless per-tap K already fills the MXU

    # ---- fold BN (running stats) + conv bias into one per-channel affine (f32)
    scale = bn_gamma / jnp.sqrt(bn_var + eps)
    bias = conv_b if conv_b is not None else jnp.zeros((cout,), jnp.float32)
    shift = bn_beta + (bias - bn_mean) * scale
    scale_p = jnp.zeros((1, cout_pad), jnp.float32).at[0, :cout].set(scale)
    shift_p = jnp.zeros((1, cout_pad), jnp.float32).at[0, :cout].set(shift)

    # ---- bf16, lane-padded weights
    w_flat = conv_w.reshape(n_taps, cin, cout).astype(jnp.bfloat16)
    if fused:
        w_p = jnp.zeros((k_total, cout_pad), jnp.bfloat16)
        w_p = w_p.at[:, :cout].set(w_flat.reshape(k_total, cout))
        w_spec = pl.BlockSpec((k_total, cout_pad), lambda b, i: (0, 0))
    else:
        w_p = jnp.zeros((n_taps, cin, cout_pad), jnp.bfloat16)
        w_p = w_p.at[:, :, :cout].set(w_flat)
        w_spec = pl.BlockSpec((n_taps, cin, cout_pad), lambda b, i: (0, 0, 0))

    # ---- single fused bf16 cast + halo pad (activations stay NHWC; no transpose here)
    x = jnp.pad(x_nhwc.astype(jnp.bfloat16),
                ((0, 0), (padding, padding), (padding, padding), (0, 0)))

    tile_h = _pick_tile_h(n, h_out, w_out, cin, cout_pad, hp, wp, k_total, fused)
    n_row_tiles = h_out // tile_h
    m = tile_h * w_out

    def kernel_fused(x_ref, w_ref, s_ref, b_ref, o_ref):
        # x_ref: (Hp, Wp, Cin) bf16 — full haloed image, VMEM-resident across row tiles
        # w_ref: (KH*KW*Cin, Cout_pad) bf16 ; s_ref/b_ref: (1, Cout_pad) f32
        # o_ref: (tile_h, W_out, Cout_pad) bf16
        row0 = pl.multiple_of(pl.program_id(1) * tile_h, tile_h)
        taps = []
        for kh in range(kh_sz):                    # static unrolled taps
            for kw in range(kw_sz):
                taps.append(x_ref[pl.ds(row0 + kh, tile_h), pl.ds(kw, w_out), :])
        patch = jnp.concatenate(taps, axis=-1)     # in-tile im2col (VMEM only)
        patch = patch.reshape(m, k_total)          # one collapse per tile
        acc = jnp.dot(patch, w_ref[...], preferred_element_type=jnp.float32)
        y = jnp.maximum(acc * s_ref[...] + b_ref[...], 0.0)       # f32 epilogue
        o_ref[...] = y.reshape(tile_h, w_out, cout_pad).astype(o_ref.dtype)

    def kernel_per_tap(x_ref, w_ref, s_ref, b_ref, o_ref, acc_ref):
        # Cin >= 128: per-tap K already fills the MXU; accumulate in VMEM scratch.
        row0 = pl.multiple_of(pl.program_id(1) * tile_h, tile_h)
        acc_ref[...] = jnp.zeros_like(acc_ref)
        for kh in range(kh_sz):
            for kw in range(kw_sz):
                patch = x_ref[pl.ds(row0 + kh, tile_h), pl.ds(kw, w_out), :]
                patch = patch.reshape(m, cin)
                acc_ref[...] += jnp.dot(patch, w_ref[kh * kw_sz + kw],
                                        preferred_element_type=jnp.float32)
        y = jnp.maximum(acc_ref[...] * s_ref[...] + b_ref[...], 0.0)
        o_ref[...] = y.reshape(tile_h, w_out, cout_pad).astype(o_ref.dtype)

    kernel = kernel_fused if fused else kernel_per_tap
    scratch_shapes = () if fused else (pltpu.VMEM((m, cout_pad), jnp.float32),)

    out = pl.pallas_call(
        kernel,
        out_shape=jax.ShapeDtypeStruct((n, h_out, w_out, cout_pad), jnp.bfloat16),
        grid=(n, n_row_tiles),
        in_specs=[
            # full haloed image per sample; block index ignores the row-tile axis so it
            # stays VMEM-resident across row tiles (no re-DMA, no shifted-view traffic)
            pl.BlockSpec((None, hp, wp, cin), lambda b, i: (b, 0, 0, 0)),
            w_spec,
            pl.BlockSpec((1, cout_pad), lambda b, i: (0, 0)),
            pl.BlockSpec((1, cout_pad), lambda b, i: (0, 0)),
        ],
        out_specs=pl.BlockSpec((None, tile_h, w_out, cout_pad),
                               lambda b, i: (b, i, 0, 0)),
        scratch_shapes=scratch_shapes,
        compiler_params=pltpu.CompilerParams(
            dimension_semantics=("parallel", "parallel"),
            vmem_limit_bytes=_VMEM_LIMIT),
    )(x, w_p, scale_p, shift_p)
    return out


def basic_conv2d_forward(x_nchw, conv_w, conv_b, bn_gamma, bn_beta, bn_mean, bn_var,
                         *, padding=1, eps=1e-5):
    """PyTorch-layout drop-in: NCHW float32 in, NCHW float32 out.

    Note: the layout conversions here are *extra* HBM passes; TPU-resident models
    should keep NHWC/bf16 activations and call `fused_conv_bn_relu` directly
    (output stays NHWC with lane-padded Cout).
    """
    cout = conv_w.shape[-1]
    x_nhwc = jnp.transpose(x_nchw, (0, 2, 3, 1))
    out = fused_conv_bn_relu(x_nhwc, conv_w, conv_b, bn_gamma, bn_beta, bn_mean,
                             bn_var, padding=padding, eps=eps)
    out = out[..., :cout].astype(jnp.float32)
    return jnp.transpose(out, (0, 3, 1, 2))


# --------------------------------------------------------------------- XLA reference
def reference_nhwc(x_nhwc, conv_w, conv_b, gamma, beta, mean, var, *, padding=1, eps=1e-5):
    y = jax.lax.conv_general_dilated(
        x_nhwc.astype(jnp.bfloat16), conv_w.astype(jnp.bfloat16),
        window_strides=(1, 1),
        padding=[(padding, padding), (padding, padding)],
        dimension_numbers=("NHWC", "HWIO", "NHWC"),
        preferred_element_type=jnp.float32)
    if conv_b is not None:
        y = y + conv_b
    y = (y - mean) / jnp.sqrt(var + eps) * gamma + beta
    return jnp.maximum(y, 0.0)


# ------------------------------------------------------------------------------ main
if __name__ == "__main__":
    key = jax.random.PRNGKey(0)
    k_x, k_w, k_b, k_g, k_be, k_m, k_v = jax.random.split(key, 7)

    N, CIN, H, W = 2, 4, 16, 16
    COUT, K = 32, 3

    x_nchw = jax.random.normal(k_x, (N, CIN, H, W), jnp.float32)       # PyTorch layout
    conv_w = jax.random.normal(k_w, (K, K, CIN, COUT), jnp.float32) / jnp.sqrt(K * K * CIN)
    conv_b = 0.1 * jax.random.normal(k_b, (COUT,), jnp.float32)
    gamma = 1.0 + 0.1 * jax.random.normal(k_g, (COUT,), jnp.float32)
    beta = 0.1 * jax.random.normal(k_be, (COUT,), jnp.float32)
    mean = 0.1 * jax.random.normal(k_m, (COUT,), jnp.float32)
    var = 1.0 + 0.1 * jax.random.uniform(k_v, (COUT,), jnp.float32)

    # ---- hot path: NHWC activations model-wide, lane-padded NHWC bf16 output
    x_nhwc = jnp.transpose(x_nchw, (0, 2, 3, 1))
    out = fused_conv_bn_relu(x_nhwc, conv_w, conv_b, gamma, beta, mean, var, padding=1)
    out = jax.block_until_ready(out)

    assert out.shape == (N, H, W, 128), out.shape
    assert out.dtype == jnp.bfloat16, out.dtype
    assert bool(jnp.all(jnp.isfinite(out.astype(jnp.float32))))
    assert bool(jnp.all(out[..., COUT:] == 0))          # lane padding is exact zeros

    ref = reference_nhwc(x_nhwc, conv_w, conv_b, gamma, beta, mean, var, padding=1)
    ref = ref.astype(jnp.bfloat16).astype(jnp.float32)  # kernel stores bf16
    got = out[..., :COUT].astype(jnp.float32)
    max_err = float(jnp.max(jnp.abs(got - ref)))
    assert bool(jnp.allclose(got, ref, atol=2e-2, rtol=2e-2)), max_err

    # ---- PyTorch-layout drop-in wrapper (compat path, not the perf path)
    out_nchw = jax.block_until_ready(
        basic_conv2d_forward(x_nchw, conv_w, conv_b, gamma, beta, mean, var, padding=1))
    assert out_nchw.shape == (N, COUT, H, W), out_nchw.shape
    ref_nchw = jnp.transpose(ref, (0, 3, 1, 2))
    assert bool(jnp.allclose(out_nchw, ref_nchw, atol=2e-2, rtol=2e-2))

    print("KERNEL_OK")
</pallas_src>

<mosaic_0001>
module attributes {stable_mosaic.version = 11 : i64} {
  func.func @kernel_fused(%arg0: i32, %arg1: i32, %arg2: memref<1x18x18x4xbf16, #tpu.memory_space<vmem>>, %arg3: memref<36x128xbf16, #tpu.memory_space<vmem>>, %arg4: memref<1x128xf32, #tpu.memory_space<vmem>>, %arg5: memref<1x128xf32, #tpu.memory_space<vmem>>, %arg6: memref<1x8x16x128xbf16, #tpu.memory_space<vmem>>) attributes {dimension_semantics = [#tpu.dimension_semantics<parallel>, #tpu.dimension_semantics<parallel>], iteration_bounds = array<i64: 2, 2>, scalar_prefetch = 0 : i64, scratch_operands = 0 : i64, tpu.core_type = #tpu.core_type<tc>, window_params = [{transform_indices = @transform_0, window_bounds = array<i64: 1, 18, 18, 4>}, {pipeline_mode = #tpu.pipeline_mode<synchronous>, transform_indices = @transform_1, window_bounds = array<i64: 36, 128>}, {pipeline_mode = #tpu.pipeline_mode<synchronous>, transform_indices = @transform_2, window_bounds = array<i64: 1, 128>}, {pipeline_mode = #tpu.pipeline_mode<synchronous>, transform_indices = @transform_3, window_bounds = array<i64: 1, 128>}, {transform_indices = @transform_4, window_bounds = array<i64: 1, 8, 16, 128>}]} {
    %c8_i32 = arith.constant 8 : i32
    %0 = arith.muli %arg1, %c8_i32 : i32
    %1 = tpu.assume_multiple %0, 8 : i32
    %c0_i32 = arith.constant 0 : i32
    %2 = arith.addi %1, %c0_i32 : i32
    %c0 = arith.constant 0 : index
    %3 = arith.index_cast %2 : i32 to index
    %c0_0 = arith.constant 0 : index
    %c0_1 = arith.constant 0 : index
    %4 = vector.load %arg2[%c0, %3, %c0_0, %c0_1] : memref<1x18x18x4xbf16, #tpu.memory_space<vmem>>, vector<1x8x16x4xbf16>
    %5 = vector.shape_cast %4 : vector<1x8x16x4xbf16> to vector<8x16x4xbf16>
    %c0_i32_2 = arith.constant 0 : i32
    %6 = arith.addi %1, %c0_i32_2 : i32
    %c0_3 = arith.constant 0 : index
    %7 = arith.index_cast %6 : i32 to index
    %c1 = arith.constant 1 : index
    %c0_4 = arith.constant 0 : index
    %8 = vector.load %arg2[%c0_3, %7, %c1, %c0_4] : memref<1x18x18x4xbf16, #tpu.memory_space<vmem>>, vector<1x8x16x4xbf16>
    %9 = vector.shape_cast %8 : vector<1x8x16x4xbf16> to vector<8x16x4xbf16>
    %c0_i32_5 = arith.constant 0 : i32
    %10 = arith.addi %1, %c0_i32_5 : i32
    %c0_6 = arith.constant 0 : index
    %11 = arith.index_cast %10 : i32 to index
    %c2 = arith.constant 2 : index
    %c0_7 = arith.constant 0 : index
    %12 = vector.load %arg2[%c0_6, %11, %c2, %c0_7] : memref<1x18x18x4xbf16, #tpu.memory_space<vmem>>, vector<1x8x16x4xbf16>
    %13 = vector.shape_cast %12 : vector<1x8x16x4xbf16> to vector<8x16x4xbf16>
    %c1_i32 = arith.constant 1 : i32
    %14 = arith.addi %1, %c1_i32 : i32
    %c0_8 = arith.constant 0 : index
    %15 = arith.index_cast %14 : i32 to index
    %c0_9 = arith.constant 0 : index
    %c0_10 = arith.constant 0 : index
    %16 = vector.load %arg2[%c0_8, %15, %c0_9, %c0_10] : memref<1x18x18x4xbf16, #tpu.memory_space<vmem>>, vector<1x8x16x4xbf16>
    %17 = vector.shape_cast %16 : vector<1x8x16x4xbf16> to vector<8x16x4xbf16>
    %c1_i32_11 = arith.constant 1 : i32
    %18 = arith.addi %1, %c1_i32_11 : i32
    %c0_12 = arith.constant 0 : index
    %19 = arith.index_cast %18 : i32 to index
    %c1_13 = arith.constant 1 : index
    %c0_14 = arith.constant 0 : index
    %20 = vector.load %arg2[%c0_12, %19, %c1_13, %c0_14] : memref<1x18x18x4xbf16, #tpu.memory_space<vmem>>, vector<1x8x16x4xbf16>
    %21 = vector.shape_cast %20 : vector<1x8x16x4xbf16> to vector<8x16x4xbf16>
    %c1_i32_15 = arith.constant 1 : i32
    %22 = arith.addi %1, %c1_i32_15 : i32
    %c0_16 = arith.constant 0 : index
    %23 = arith.index_cast %22 : i32 to index
    %c2_17 = arith.constant 2 : index
    %c0_18 = arith.constant 0 : index
    %24 = vector.load %arg2[%c0_16, %23, %c2_17, %c0_18] : memref<1x18x18x4xbf16, #tpu.memory_space<vmem>>, vector<1x8x16x4xbf16>
    %25 = vector.shape_cast %24 : vector<1x8x16x4xbf16> to vector<8x16x4xbf16>
    %c2_i32 = arith.constant 2 : i32
    %26 = arith.addi %1, %c2_i32 : i32
    %c0_19 = arith.constant 0 : index
    %27 = arith.index_cast %26 : i32 to index
    %c0_20 = arith.constant 0 : index
    %c0_21 = arith.constant 0 : index
    %28 = vector.load %arg2[%c0_19, %27, %c0_20, %c0_21] : memref<1x18x18x4xbf16, #tpu.memory_space<vmem>>, vector<1x8x16x4xbf16>
    %29 = vector.shape_cast %28 : vector<1x8x16x4xbf16> to vector<8x16x4xbf16>
    %c2_i32_22 = arith.constant 2 : i32
    %30 = arith.addi %1, %c2_i32_22 : i32
    %c0_23 = arith.constant 0 : index
    %31 = arith.index_cast %30 : i32 to index
    %c1_24 = arith.constant 1 : index
    %c0_25 = arith.constant 0 : index
    %32 = vector.load %arg2[%c0_23, %31, %c1_24, %c0_25] : memref<1x18x18x4xbf16, #tpu.memory_space<vmem>>, vector<1x8x16x4xbf16>
    %33 = vector.shape_cast %32 : vector<1x8x16x4xbf16> to vector<8x16x4xbf16>
    %c2_i32_26 = arith.constant 2 : i32
    %34 = arith.addi %1, %c2_i32_26 : i32
    %c0_27 = arith.constant 0 : index
    %35 = arith.index_cast %34 : i32 to index
    %c2_28 = arith.constant 2 : index
    %c0_29 = arith.constant 0 : index
    %36 = vector.load %arg2[%c0_27, %35, %c2_28, %c0_29] : memref<1x18x18x4xbf16, #tpu.memory_space<vmem>>, vector<1x8x16x4xbf16>
    %37 = vector.shape_cast %36 : vector<1x8x16x4xbf16> to vector<8x16x4xbf16>
    %38 = tpu.concatenate %5, %9, %13, %17, %21, %25, %29, %33, %37 in 2 : vector<8x16x4xbf16>, vector<8x16x4xbf16>, vector<8x16x4xbf16>, vector<8x16x4xbf16>, vector<8x16x4xbf16>, vector<8x16x4xbf16>, vector<8x16x4xbf16>, vector<8x16x4xbf16>, vector<8x16x4xbf16> -> vector<8x16x36xbf16>
    %39 = vector.shape_cast %38 : vector<8x16x36xbf16> to vector<128x36xbf16>
    %c0_30 = arith.constant 0 : index
    %c0_31 = arith.constant 0 : index
    %40 = vector.load %arg3[%c0_30, %c0_31] : memref<36x128xbf16, #tpu.memory_space<vmem>>, vector<36x128xbf16>
    %cst = arith.constant dense<0.000000e+00> : vector<128x128xf32>
    %41 = tpu.matmul %39, %40, %cst {dimension_numbers = #tpu.dot_dimension_numbers<[1], [0], [0], [1], [0, 0, 1, 1], [], []>} : vector<128x36xbf16>, vector<36x128xbf16>, vector<128x128xf32> -> vector<128x128xf32>
    %c0_32 = arith.constant 0 : index
    %c0_33 = arith.constant 0 : index
    %42 = vector.load %arg4[%c0_32, %c0_33] : memref<1x128xf32, #tpu.memory_space<vmem>>, vector<1x128xf32>
    %43 = vector.broadcast %42 : vector<1x128xf32> to vector<128x128xf32>
    %44 = arith.mulf %41, %43 : vector<128x128xf32>
    %c0_34 = arith.constant 0 : index
    %c0_35 = arith.constant 0 : index
    %45 = vector.load %arg5[%c0_34, %c0_35] : memref<1x128xf32, #tpu.memory_space<vmem>>, vector<1x128xf32>
    %46 = vector.broadcast %45 : vector<1x128xf32> to vector<128x128xf32>
    %47 = arith.addf %44, %46 : vector<128x128xf32>
    %cst_36 = arith.constant 0.000000e+00 : f32
    %48 = vector.broadcast %cst_36 : f32 to vector<128x128xf32>
    %49 = arith.maximumf %47, %48 : vector<128x128xf32>
    %50 = vector.shape_cast %49 : vector<128x128xf32> to vector<8x16x128xf32>
    %51 = arith.truncf %50 : vector<8x16x128xf32> to vector<8x16x128xbf16>
    %c0_37 = arith.constant 0 : index
    %c0_38 = arith.constant 0 : index
    %c0_39 = arith.constant 0 : index
    %c0_40 = arith.constant 0 : index
    %52 = vector.load %arg6[%c0_37, %c0_38, %c0_39, %c0_40] : memref<1x8x16x128xbf16, #tpu.memory_space<vmem>>, vector<1x8x16x128xbf16>
    %53 = vector.shape_cast %52 : vector<1x8x16x128xbf16> to vector<8x16x128xbf16>
    %54 = vector.shape_cast %51 : vector<8x16x128xbf16> to vector<1x8x16x128xbf16>
    tpu.vector_store %arg6[%c0_37, %c0_38, %c0_39, %c0_40], %54 {strides = array<i32>} : memref<1x8x16x128xbf16, #tpu.memory_space<vmem>>, vector<1x8x16x128xbf16>,
    return
  }
  func.func @transform_0(%arg0: i32, %arg1: i32) -> (i32, i32, i32, i32) {
    %c0_i32 = arith.constant 0 : i32
    %c0_i32_0 = arith.constant 0 : i32
    %c0_i32_1 = arith.constant 0 : i32
    %c0_i32_2 = arith.constant 0 : i32
    return %arg0, %c0_i32, %c0_i32_0, %c0_i32_1 : i32, i32, i32, i32
  }
  func.func @transform_1(%arg0: i32, %arg1: i32) -> (i32, i32) {
    %c0_i32 = arith.constant 0 : i32
    %c0_i32_0 = arith.constant 0 : i32
    %c0_i32_1 = arith.constant 0 : i32
    return %c0_i32, %c0_i32_0 : i32, i32
  }
  func.func @transform_2(%arg0: i32, %arg1: i32) -> (i32, i32) {
    %c0_i32 = arith.constant 0 : i32
    %c0_i32_0 = arith.constant 0 : i32
    %c0_i32_1 = arith.constant 0 : i32
    return %c0_i32, %c0_i32_0 : i32, i32
  }
  func.func @transform_3(%arg0: i32, %arg1: i32) -> (i32, i32) {
    %c0_i32 = arith.constant 0 : i32
    %c0_i32_0 = arith.constant 0 : i32
    %c0_i32_1 = arith.constant 0 : i32
    return %c0_i32, %c0_i32_0 : i32, i32
  }
  func.func @transform_4(%arg0: i32, %arg1: i32) -> (i32, i32, i32, i32) {
    %c0_i32 = arith.constant 0 : i32
    %c0_i32_0 = arith.constant 0 : i32
    %c0_i32_1 = arith.constant 0 : i32
    return %arg0, %arg1, %c0_i32, %c0_i32_0 : i32, i32, i32, i32
  }
}

</mosaic_0001>

<bundles_post_ra>
// kernel: tpu_custom_call.1
= control target key start
LH: loop header
LB: loop body
LE: loop exit
PB: predicated region body
PF: predicated region fallthrough
CT: control target
= control target key end

     0   :  { %9 = vsyncpa [#allocation3], 0  ;;  %s2862_s0 = inlined_call_operand.vmem [shape: bf16[2,18,18,4], index: 0, kind: input, shape index: {}]   ;;  %s2863_s1 = inlined_call_operand.vmem [shape: bf16[36,128], index: 1, kind: input, shape index: {}]   ;;  %s2864_s2 = inlined_call_operand.vmem [shape: f32[1,128], index: 2, kind: input, shape index: {}]   ;;  %s2865_s3 = inlined_call_operand.vmem [shape: f32[1,128], index: 3, kind: input, shape index: {}]   ;;  %s2866_s4 = inlined_call_operand.hbm [shape: bf16[2,16,16,128], index: 4, kind: output, shape index: {}]  }
   0x1   :  { %11 = vsyncpa [#allocation3 + $0x1], 0  ;;  %s2170_s15 = smov 0   ;;  %s2172_s16 = smov 0  }
   0x2   :  { %s2174_s17 = smov 0   ;;  %s2176_s18 = smov 0  }
   0x3   :  { %s2178_s19 = smov 0   ;;  %s2180_s20 = smov 0  }
   0x4   :  { %s2182_s21 = smov 0   ;;  %s2184_s22 = smov 0  }
   0x5 LB: > { %s1593_s23 = sadd.s32 4294967295, %s2133_s22   ;;  %s1594_s24 = sadd.s32 4294967294, %s2133_s22   ;;  %s2133_s22 = sphi %s2184_s22, %s17_s22   ;;  %s2129_s21 = sphi %s2182_s21, %s2875_s21   ;;  %s2125_s20 = sphi %s2180_s20, %s2874_s20   ;;  %s2121_s19 = sphi %s2178_s19, %s2873_s19   ;;  %s2117_s18 = sphi %s2176_s18, %s2872_s18   ;;  %s2113_s17 = sphi %s2174_s17, %s2871_s17   ;;  %s2109_s16 = sphi %s2172_s16, %s2870_s16   ;;  %s2105_s15 = sphi %s2170_s15, %s2869_s15  }
   0x6   : > { %s26_s25 = sadd.s32 1, %s2125_s20  ;;  %s29_s26 = sadd.s32 1, %s2129_s21 }
   0x7   : > { %p27_p0 = scmp.ge.s32.totalorder %s26_s25, 2  ;;  %p137_p1 = scmp.ne.s32.totalorder %s2113_s17, %s2109_s16 }
   0x8   : > { %p138_p2 = scmp.eq.s32.totalorder %s1593_s23, 3  ;;  %p143_p5 = scmp.ne.s32.totalorder %s2109_s16, %s2105_s15 }
   0x9   : > { %s2877_s25 = smov (%p27_p0, %s26_s25), 0  ;;  %s2879_s26 = smov (!%p27_p0, %s29_s26), %s2129_s21 }
   0xa   : > { %s123_s27 = ssub.s32 %s2125_s20, %s2877_s25  ;;  %p2221_p3 = por %p138_p2, %p137_p1 }
   0xb   : > { %p31_p4 = scmp.ge.s32.totalorder %s2879_s26, 2  ;;  %p144_p6 = scmp.eq.s32.totalorder %s1594_s24, 3 }
   0xc   : > { %p1597_p7 = scmp.ge.s32.totalorder %s2133_s22, 1  ;;  %p179_p9 = scmp.lt.s32.totalorder %s2133_s22, 5 }
   0xd   : > { %s2881_s26 = smov (%p31_p4, %s2879_s26), 0  ;;  %p2230_p8 = por %p144_p6, %p143_p5 }
   0xe   : > { %s122_s30 = ssub.s32 %s2129_s21, %s2881_s26  ;;  %s127_s5 = sadd.s32 1, %s2113_s17 }
   0xf   : > { %s124_s6 = sor.u32 %s123_s27, %s122_s30  ;;  %p180_p10 = pnand %p1597_p7, %p179_p9 }
  0x10   : > { %p125_p11 = scmp.eq.s32.totalorder %s124_s6, 0  ;;  %p205_p12 = scmp.lt.s32.totalorder (!%p180_p10), %s2121_s19, 1 }
  0x11   : > { %183 = sbr.rel (%p180_p10) target bundleno = 495 (0x1ef), region = 36  ;;  %s2135_s23 = smov (!%p180_p10), 12  }
  0x12   : > { %s2239_s7 = scalar_select %p125_p11, %s2113_s17, %s127_s5  }
  0x13   : > { %s1779_s9 = smul.u32 (!%p180_p10), 96, %s2117_s18  ;;  %s2136_s24 = smov (!%p180_p10), 8  }
  0x14   : > { %s2137_s27 = smov (!%p180_p10), 4   ;;  %s2138_s30 = smov (!%p180_p10), 16  }
  0x15   : > { %s2139_s5 = smov (!%p180_p10), 20   ;;  %s2140_s6 = smov (!%p180_p10), 24  }
  0x16   : > { %s206_s8 = scalar_select %p205_p12, %s2121_s19, 1  ;;  %vm521_vm0 = vcmask 1046528   ;;  %vm384_vm1 = vsmask.f32 7424  ;;  %vm1247_vm2 = vcmask 1041408   ;;  %vm1074_vm3 = vcmask 31744  }
  0x17   : > { %vm1091_vm4 = vcmask 64512   ;;  %vm1108_vm5 = vcmask 97280   ;;  %vm1125_vm6 = vcmask 130048   ;;  %vm1142_vm7 = vcmask 162816   ;;  %s1775_s12 = sshll.u32 %s2121_s19, 5 }
  0x18   : > { %s1885_s10 = smul.u32 216, %s206_s8  ;;  %s2141_s8 = smov 28   ;;  %vm1159_vm8 = vcmask 195584   ;;  %vm1176_vm9 = vcmask 228352   ;;  %vm1193_vm10 = vcmask 261120   ;;  %vm1230_vm11 = vcmask 293888  }
  0x1a   : > { %s209_s13 = scalar_lea.vmem %s2862_s0, %s1885_s10 }
  0x1b   : > { %s2247_s14 = scalar_lea.vmem %s209_s13, %s1779_s9  ;;  %s2142_s9 = smov 32  }
  0x1c   : > { %v1613_v0 = vld [vmem:[%s2247_s14 + $0x3c] sm:$0xf]  ;;  %v2251_v1 = vld [vmem:[%s2247_s14 + $0x40] sm:$0xf]  ;;  %v1605_v3 = vld [vmem:[%s2247_s14 + $0xc] sm:$0xf] }
  0x1d   : > { %v2254_v2 = vcombine.low %v1613_v0, %v2251_v1  ;;  %v2258_v4 = vld [vmem:[%s2247_s14 + $0x10] sm:$0xf]  ;;  %v225_v6 = vld [vmem:[%s2247_s14 + $0x34] sm:$0xf]  ;;  %v217_v12 = vld [vmem:[%s2247_s14 + $0x4] sm:$0xf] }
  0x1e   : > { %v2261_v5 = vcombine.low %v1605_v3, %v2258_v4  ;;  %v244_v7 = vld [vmem:[%s2247_s14 + $0x30] sm:$0xe]  ;;  %v2268_v8 = vld [vmem:[%s2247_s14 + $0x38] ss:$0 sps:$4 sm:$0x11]  }
  0x1f   : > { %610 = vrot.lane.b32.xlu1 %v2254_v2, %s2135_s23  ;;  %v1691_v9 = vcombine.low %v244_v7, %v225_v6  ;;  %v224_v10 = vld [vmem:[%s2247_s14 + $0x30] sm:$0xf]  ;;  %v693_v11 = vshll.u32 %v2254_v2, 16  ;;  %v535_v14 = vrot.slane %v2268_v8, 1  ;;  %v240_v15 = vld [vmem:[%s2247_s14] sm:$0xe] }
  0x20   : > { %602 = vrot.lane.b32.xlu0 %v2261_v5, %s2135_s23  ;;  %v216_v16 = vld [vmem:[%s2247_s14] sm:$0xf]  ;;  %v645_v17 = vshll.u32 %v2261_v5, 16  ;;  %v2279_v18 = vcombine.low %v224_v10, %v225_v6  ;;  %v1973_v19 = vld [vmem:[%s2247_s14 + $0x8] ss:$0 sps:$4 sm:$0x11]   ;;  %v1687_v20 = vcombine.low %v240_v15, %v217_v12 }
  0x21   : > { %v534_v13 = vrot.slane %v1691_v9, 1  ;;  %v226_v21 = vld [vmem:[%s2247_s14 + $0x3c] sm:$0xf]  ;;  %v2284_v23 = vcombine.low %v216_v16, %v217_v12  ;;  %v227_v24 = vld [vmem:[%s2247_s14 + $0x40] sm:$0xf]  ;;  %v523_v27 = vrot.slane %v1973_v19, 1 }
  0x22   : > { %v245_v25 = vld [vmem:[%s2247_s14 + $0x3c] sm:$0xe]  ;;  %v522_v26 = vrot.slane %v1687_v20, 1  ;;  %v1977_v28 = vld [vmem:[%s2247_s14 + $0x44] ss:$0 sps:$4 sm:$0x11]   ;;  %v2291_v31 = vcombine.low %v226_v21, %v227_v24 }
  0x23   : > { %v536_v22 = vsel %vm521_vm0, %v534_v13, %v535_v14  ;;  %v1692_v29 = vcombine.low %v245_v25, %v227_v24  ;;  %v434_v30 = vshrl.u32 %v2279_v18, 16  ;;  %v218_v32 = vld [vmem:[%s2247_s14 + $0xc] sm:$0xf]  ;;  %v219_v33 = vld [vmem:[%s2247_s14 + $0x10] sm:$0xf]  ;;  %v538_v36 = vrot.slane %v1977_v28, 1 }
  0x24   : > { %554 = vrot.lane.b32.xlu1 %v536_v22, %s2136_s24  ;;  %v524_v34 = vsel %vm521_vm0, %v522_v26, %v523_v27  ;;  %v241_v37 = vld [vmem:[%s2247_s14 + $0xc] sm:$0xe]  ;;  %v2297_v38 = vcombine.low %v218_v32, %v219_v33  ;;  %v1980_v39 = vld [vmem:[%s2247_s14 + $0x14] ss:$0 sps:$4 sm:$0x11]   ;;  %v386_v41 = vshrl.u32 %v2284_v23, 16 }
  0x25   : > { %v537_v35 = vrot.slane %v1692_v29, 1  ;;  %546 = vrot.lane.b32.xlu0 %v524_v34, %s2136_s24  ;;  %v1688_v40 = vcombine.low %v241_v37, %v219_v33  ;;  %v388_v42 = vshll.u32 %v2284_v23, 16  ;;  %v393_v43 = vshll.u32 %v1973_v19, 16  ;;  %v1615_v52 = vld [vmem:[%s2247_s14 + $0x48] sm:$0xf] }
  0x26   : > { %v398_v45 = vshrl.u32 %v2297_v38, 16  ;;  %v400_v46 = vshll.u32 %v2297_v38, 16  ;;  %v446_v47 = vshrl.u32 %v2291_v31, 16  ;;  %v526_v49 = vrot.slane %v1980_v39, 1  ;;  %v2311_v57 = vld [vmem:[%s2247_s14 + $0x4c] sm:$0xf] }
  0x27   : > { %v539_v44 = vsel %vm521_vm0, %v537_v35, %v538_v36  ;;  %v525_v48 = vrot.slane %v1688_v40, 1  ;;  %v405_v50 = vshll.u32 %v1980_v39, 16  ;;  %v390_v51 = vrot.slane %v388_v42, 1  ;;  %v1607_v62 = vld [vmem:[%s2247_s14 + $0x18] sm:$0xf] }
  0x28   : > { %556 = vrot.lane.b32.xlu1 %v539_v44, %s2136_s24  ;;  %v402_v53 = vrot.slane %v400_v46, 1  ;;  %v395_v54 = vrot.slane %v393_v43, 1  ;;  %v448_v55 = vshll.u32 %v2291_v31, 16  ;;  %v453_v56 = vshll.u32 %v1977_v28, 16  ;;  %v2317_v63 = vld [vmem:[%s2247_s14 + $0x1c] sm:$0xf] }
  0x29   : > { %v527_v58 = vsel %vm521_vm0, %v525_v48, %v526_v49  ;;  %v407_v59 = vrot.slane %v405_v50, 1  ;;  %v391_v60 = vor.u32 %v390_v51, %v386_v41  ;;  %v436_v61 = vshll.u32 %v2279_v18, 16  ;;  %v2324_v13 = vld [vmem:[%s2247_s14 + $0x44] ss:$0 sps:$4 sm:$0x11]  }
  0x2a   : > { %548 = vrot.lane.b32.xlu0 %v527_v58, %s2136_s24  ;;  %v403_v0 = vor.u32 %v402_v53, %v398_v45  ;;  %v450_v3 = vrot.slane %v448_v55, 1  ;;  %v455_v6 = vrot.slane %v453_v56, 1  ;;  %v441_v7 = vshll.u32 %v2268_v8, 16  ;;  %v2329_v20 = vld [vmem:[%s2247_s14 + $0x14] ss:$0 sps:$4 sm:$0x11]  }
  0x2b   : > { %v396_v9 = vsel %vm384_vm1, %v391_v60, %v395_v54  ;;  %v438_v10 = vrot.slane %v436_v61, 1  ;;  %v1700_v12 = vcombine.low %v1615_v52, %v2311_v57  ;;  %v1696_v19 = vcombine.low %v1607_v62, %v2317_v63  ;;  %v2336_v24 = vld [vmem:[%s2247_s14 + $0x50] ss:$0 sps:$4 sm:$0x11]   ;;  %v1633_v35 = vld [vmem:[%s2247_s14 + $0x3c] sm:$0xe] }
  0x2c   : > { %v408_v14 = vsel %vm384_vm1, %v403_v0, %v407_v59  ;;  %v451_v15 = vor.u32 %v450_v3, %v446_v47  ;;  %v443_v16 = vrot.slane %v441_v7, 1  ;;  %v691_v21 = vshrl.u32 %v2254_v2, 16  ;;  %v1629_v43 = vld [vmem:[%s2247_s14 + $0xc] sm:$0xe]  ;;  %v1634_v45 = vld [vmem:[%s2247_s14 + $0x48] sm:$0xe] }
  0x2d   : > { %483 = vrot.lane.b32.xlu1 %v408_v14, %s2137_s27  ;;  %v439_v8 = vor.u32 %v438_v10, %v434_v30  ;;  %v695_v22 = vrot.slane %v693_v11, 1  ;;  %v705_v26 = vshll.u32 %v1700_v12, 16  ;;  %v698_v27 = vshll.u32 %v2324_v13, 16  ;;  %v2347_v11 = vld [vmem:[%s2247_s14 + $0x20] ss:$0 sps:$4 sm:$0x11]  }
  0x2e   : > { %481 = vrot.lane.b32.xlu0 %v396_v9, %s2137_s27  ;;  %v456_v25 = vsel %vm384_vm1, %v451_v15, %v455_v6  ;;  %v643_v28 = vshrl.u32 %v2261_v5, 16  ;;  %v657_v30 = vshll.u32 %v1696_v19, 16  ;;  %v647_v32 = vrot.slane %v645_v17, 1  ;;  %v1630_v50 = vld [vmem:[%s2247_s14 + $0x18] sm:$0xe] }
  0x2f   : > { %v444_v29 = vsel %vm384_vm1, %v439_v8, %v443_v16  ;;  %v650_v2 = vshll.u32 %v2329_v20, 16  ;;  %v696_v33 = vor.u32 %v695_v22, %v691_v21  ;;  %v700_v34 = vrot.slane %v698_v27, 1  ;;  %v1647_v55 = vld [vmem:[%s2247_s14 + $0x48] sm:$0xf]  ;;  %v2367_v56 = vld [vmem:[%s2247_s14 + $0x4c] sm:$0xf] }
  0x30   : > { %v648_v36 = vor.u32 %v647_v32, %v643_v28  ;;  %v703_v37 = vshrl.u32 %v1700_v12, 16  ;;  %v707_v39 = vrot.slane %v705_v26, 1  ;;  %v710_v5 = vshll.u32 %v2336_v24, 16  ;;  %v1639_v3 = vld [vmem:[%s2247_s14 + $0x18] sm:$0xf] }
  0x31   : > { %491 = vrot.lane.b32.xlu1 %v456_v25, %s2137_s27  ;;  %v652_v17 = vrot.slane %v650_v2, 1  ;;  %v655_v40 = vshrl.u32 %v1696_v19, 16  ;;  %v659_v41 = vrot.slane %v657_v30, 1  ;;  %v662_v42 = vshll.u32 %v2347_v11, 16  ;;  %v2378_v6 = vld [vmem:[%s2247_s14 + $0x1c] sm:$0xf] }
  0x32   : > { %489 = vrot.lane.b32.xlu0 %v444_v29, %s2137_s27  ;;  %v1715_v44 = vcombine.low %v1633_v35, %v2251_v1  ;;  %v701_v46 = vsel %vm384_vm1, %v696_v33, %v700_v34  ;;  %v708_v47 = vor.u32 %v707_v39, %v703_v37  ;;  %v712_v48 = vrot.slane %v710_v5, 1  ;;  %v1641_v16 = vld [vmem:[%s2247_s14 + $0x24] sm:$0xf]  ;;  %v2398_v21 = vld [vmem:[%s2247_s14 + $0x50] ss:$0 sps:$4 sm:$0x11]  }
  0x33   : > { %v1711_v49 = vcombine.low %v1629_v43, %v2258_v4  ;;  %v653_v51 = vsel %vm384_vm1, %v648_v36, %v652_v17  ;;  %v660_v52 = vor.u32 %v659_v41, %v655_v40  ;;  %v664_v53 = vrot.slane %v662_v42, 1  ;;  %v2405_v27 = vld [vmem:[%s2247_s14 + $0x20] ss:$0 sps:$4 sm:$0x11]   ;;  %v228_v37 = vld [vmem:[%s2247_s14 + $0x48] sm:$0xf] }
  0x34   : > { %v790_v1 = vrot.slane %v1715_v44, 1  ;;  %v791_v54 = vrot.slane %v2324_v13, 1  ;;  %v1716_v58 = vcombine.low %v1634_v45, %v2311_v57  ;;  %v1712_v4 = vcombine.low %v1630_v50, %v2317_v63  ;;  %v1649_v63 = vld [vmem:[%s2247_s14 + $0x54] sm:$0xf]  ;;  %v2387_v13 = vld [vmem:[%s2247_s14 + $0x58] sm:$0xf] }
  0x35   : > { %612 = vrot.lane.b32.xlu1 %v1700_v12, %s2135_s23  ;;  %v713_v59 = vsel %vm384_vm1, %v708_v47, %v712_v48  ;;  %v665_v60 = vsel %vm384_vm1, %v660_v52, %v664_v53  ;;  %v778_v61 = vrot.slane %v1711_v49, 1  ;;  %v779_v62 = vrot.slane %v2329_v20, 1  ;;  %v2414_v34 = vld [vmem:[%s2247_s14 + $0x2c] ss:$0 sps:$4 sm:$0x11]  }
  0x36   : > { %604 = vrot.lane.b32.xlu0 %v1696_v19, %s2135_s23  ;;  %v1723_v0 = vcombine.low %v1647_v55, %v2367_v56  ;;  %v792_v57 = vsel %vm521_vm0, %v790_v1, %v791_v54  ;;  %v793_v7 = vrot.slane %v1716_v58, 1  ;;  %v794_v9 = vrot.slane %v2336_v24, 1  ;;  %v2393_v19 = vld [vmem:[%s2247_s14 + $0x28] sm:$0xf]  ;;  %v2419_v39 = vld [vmem:[%s2247_s14 + $0x4c] sm:$0xf] }
  0x37   : > { %v781_v10 = vrot.slane %v1712_v4, 1  ;;  %v782_v12 = vrot.slane %v2347_v11, 1  ;;  %v780_v14 = vsel %vm521_vm0, %v778_v61, %v779_v62  ;;  %v1719_v15 = vcombine.low %v1639_v3, %v2378_v6  ;;  %v2410_v11 = vld [vmem:[%s2247_s14 + $0x5c] ss:$0 sps:$4 sm:$0x11]  }
  0x38   : > { %v949_v20 = vshll.u32 %v1723_v0, 16  ;;  %v1724_v8 = vcombine.low %v1649_v63, %v2387_v13  ;;  %v795_v22 = vsel %vm521_vm0, %v793_v7, %v794_v9  ;;  %v1720_v24 = vcombine.low %v1641_v16, %v2393_v19  ;;  %v220_v17 = vld [vmem:[%s2247_s14 + $0x18] sm:$0xf]  ;;  %v2423_v40 = vld [vmem:[%s2247_s14 + $0x1c] sm:$0xf] }
  0x39   : > { %746 = vrot.lane.b32.xlu1 %v701_v46, %s2138_s30  ;;  %v783_v25 = vsel %vm521_vm0, %v781_v10, %v782_v12  ;;  %v901_v26 = vshll.u32 %v1719_v15, 16  ;;  %v947_v28 = vshrl.u32 %v1723_v0, 16  ;;  %v954_v32 = vshll.u32 %v2398_v21, 16  ;;  %v1667_v41 = vld [vmem:[%s2247_s14 + $0x48] sm:$0xe] }
  0x3a   : > { %738 = vrot.lane.b32.xlu0 %v653_v51, %s2138_s30  ;;  %v951_v29 = vrot.slane %v949_v20, 1  ;;  %v961_v30 = vshll.u32 %v1724_v8, 16  ;;  %v899_v2 = vshrl.u32 %v1719_v15, 16  ;;  %v913_v33 = vshll.u32 %v1720_v24, 16  ;;  %v1663_v46 = vld [vmem:[%s2247_s14 + $0x18] sm:$0xe] }
  0x3b   : > { %v903_v35 = vrot.slane %v901_v26, 1  ;;  %v906_v36 = vshll.u32 %v2405_v27, 16  ;;  %v956_v42 = vrot.slane %v954_v32, 1  ;;  %v959_v43 = vshrl.u32 %v1724_v8, 16  ;;  %v222_v9 = vld [vmem:[%s2247_s14 + $0x24] sm:$0xf] }
  0x3c   : > { %v952_v5 = vor.u32 %v951_v29, %v947_v28  ;;  %v963_v44 = vrot.slane %v961_v30, 1  ;;  %v966_v45 = vshll.u32 %v2410_v11, 16  ;;  %v911_v47 = vshrl.u32 %v1720_v24, 16  ;;  %v2441_v4 = vld [vmem:[%s2247_s14 + $0x50] ss:$0 sps:$4 sm:$0x11]  }
  0x3d   : > { %748 = vrot.lane.b32.xlu1 %v713_v59, %s2138_s30  ;;  %v915_v48 = vrot.slane %v913_v33, 1  ;;  %v918_v49 = vshll.u32 %v2414_v34, 16  ;;  %v2432_v50 = vcombine.low %v228_v37, %v2419_v39  ;;  %v904_v51 = vor.u32 %v903_v35, %v899_v2  ;;  %v2458_v10 = vld [vmem:[%s2247_s14 + $0x28] sm:$0xf]  ;;  %v1668_v12 = vld [vmem:[%s2247_s14 + $0x54] sm:$0xe] }
  0x3e   : > { %740 = vrot.lane.b32.xlu0 %v665_v60, %s2138_s30  ;;  %v908_v52 = vrot.slane %v906_v36, 1  ;;  %v2435_v53 = vcombine.low %v220_v17, %v2423_v40  ;;  %v1739_v1 = vcombine.low %v1667_v41, %v2367_v56  ;;  %v1735_v54 = vcombine.low %v1663_v46, %v2378_v6  ;;  %v2447_v56 = vld [vmem:[%s2247_s14 + $0x20] ss:$0 sps:$4 sm:$0x11]   ;;  %v230_v6 = vld [vmem:[%s2247_s14 + $0x54] sm:$0xf] }
  0x3f   : > { %v964_v55 = vor.u32 %v963_v44, %v959_v43  ;;  %v968_v58 = vrot.slane %v966_v45, 1  ;;  %v957_v59 = vsel %vm384_vm1, %v952_v5, %v956_v42  ;;  %v916_v60 = vor.u32 %v915_v48, %v911_v47  ;;  %v2483_v36 = vld [vmem:[%s2247_s14 + $0x5c] ss:$0 sps:$4 sm:$0x11]  }
  0x40   : > { %v920_v61 = vrot.slane %v918_v49, 1  ;;  %v460_v62 = vshll.u32 %v2432_v50, 16  ;;  %v412_v3 = vshll.u32 %v2435_v53, 16  ;;  %v1046_v63 = vrot.slane %v1739_v1, 1 }
  0x41   : > { %810 = vrot.lane.b32.xlu1 %v792_v57, %s2139_s5  ;;  %v2453_v57 = vld [vmem:[%s2247_s14 + $0x58] sm:$0xf]  ;;  %v1047_v7 = vrot.slane %v2398_v21, 1  ;;  %v1035_v16 = vrot.slane %v2405_v27, 1  ;;  %v465_v20 = vshll.u32 %v2441_v4, 16  ;;  %v410_v26 = vshrl.u32 %v2435_v53, 16 }
  0x42   : > { %802 = vrot.lane.b32.xlu0 %v780_v14, %s2139_s5  ;;  %v969_v14 = vsel %vm384_vm1, %v964_v55, %v968_v58  ;;  %v921_v21 = vsel %vm384_vm1, %v916_v60, %v920_v61  ;;  %v414_v28 = vrot.slane %v412_v3, 1  ;;  %v417_v27 = vshll.u32 %v2447_v56, 16 }
  0x43   : > { %v2475_v29 = vcombine.low %v222_v9, %v2458_v10  ;;  %v1740_v30 = vcombine.low %v1668_v12, %v2387_v13  ;;  %v467_v2 = vrot.slane %v465_v20, 1  ;;  %v1048_v33 = vsel %vm521_vm0, %v1046_v63, %v1047_v7  ;;  %v2488_v13 = vld [vmem:[%s2247_s14 + $0x2c] ss:$0 sps:$4 sm:$0x11]   ;;  %v243_v63 = vld [vmem:[%s2247_s14 + $0x24] sm:$0xe] }
  0x44   : > { %v415_v17 = vor.u32 %v414_v28, %v410_v26  ;;  %v419_v41 = vrot.slane %v417_v27, 1  ;;  %v1050_v43 = vrot.slane %v2410_v11, 1  ;;  %v1038_v45 = vrot.slane %v2414_v34, 1  ;;  %v242_v34 = vld [vmem:[%s2247_s14 + $0x18] sm:$0xe] }
  0x45   : > { %812 = vrot.lane.b32.xlu1 %v795_v22, %s2139_s5  ;;  %v458_v22 = vshrl.u32 %v2432_v50, 16  ;;  %v1049_v42 = vrot.slane %v1740_v30, 1  ;;  %v477_v49 = vshll.u32 %v2483_v36, 16  ;;  %v422_v1 = vshrl.u32 %v2475_v29, 16  ;;  %v1619_v28 = vld [vmem:[%s2247_s14 + $0x60] sm:$0xf] }
  0x46   : > { %804 = vrot.lane.b32.xlu0 %v783_v25, %s2139_s5  ;;  %v2470_v25 = vcombine.low %v230_v6, %v2453_v57  ;;  %v1689_v61 = vcombine.low %v242_v34, %v2423_v40  ;;  %v247_v6 = vld [vmem:[%s2247_s14 + $0x54] sm:$0xe]  ;;  %v541_v7 = vrot.slane %v2441_v4, 1  ;;  %v529_v9 = vrot.slane %v2447_v56, 1  ;;  %v1609_v56 = vld [vmem:[%s2247_s14 + $0x24] sm:$0xf] }
  0x47   : > { %v1051_v55 = vsel %vm521_vm0, %v1049_v42, %v1050_v43  ;;  %v1690_v4 = vcombine.low %v243_v63, %v2458_v10  ;;  %v2535_v10 = vld [vmem:[%s2247_s14 + $0x64] sm:$0xf]  ;;  %v2556_v42 = vld [vmem:[%s2247_s14 + $0x2c] ss:$0 sps:$4 sm:$0x11]  }
  0x48   : > { %v472_v37 = vshll.u32 %v2470_v25, 16  ;;  %v470_v47 = vshrl.u32 %v2470_v25, 16  ;;  %v528_v40 = vrot.slane %v1689_v61, 1  ;;  %v2039_v43 = vld [vmem:[%s2863_s1 + $0x8] sm:$0xff]   ;;  %v2040_v34 = vld [vmem:[%s2863_s1] sm:$0xff]  }
  0x49   : > { %866 = vrot.lane.b32.xlu1 %v1723_v0, %s2140_s6  ;;  %v909_v0 = vsel %vm384_vm1, %v904_v51, %v908_v52  ;;  %v246_v51 = vld [vmem:[%s2247_s14 + $0x48] sm:$0xe]  ;;  %v420_v52 = vsel %vm384_vm1, %v415_v17, %v419_v41  ;;  %v531_v30 = vrot.slane %v1690_v4, 1  ;;  %v2551_v41 = vld [vmem:[%s2247_s14 + $0x5c] ss:$0 sps:$4 sm:$0x11]  }
  0x4a   : > { %858 = vrot.lane.b32.xlu0 %v1719_v15, %s2140_s6  ;;  %v1034_v15 = vrot.slane %v1735_v54, 1  ;;  %v474_v48 = vrot.slane %v472_v37, 1  ;;  %v429_v54 = vshll.u32 %v2488_v13, 16  ;;  %v1693_v60 = vcombine.low %v246_v51, %v2419_v39  ;;  %v2038_v37 = vld [vmem:[%s2863_s1 + $0x10] ss:$0 sps:$4 sm:$0x33]  }
  0x4b   : > { %v530_v27 = vsel %vm521_vm0, %v528_v40, %v529_v9  ;;  %1883 = vmatprep.subr.msk.bf16.mxu0 %vm1247_vm2, %v2038_v37  ;;  %1884 = vmatprep.subr.msk.bf16.mxu1 %vm1247_vm2, %v2038_v37  ;;  %v1631_v9 = vld [vmem:[%s2247_s14 + $0x24] sm:$0xe] }
  0x4c   : > { %v1036_v5 = vsel %vm521_vm0, %v1034_v15, %v1035_v16  ;;  %v475_v58 = vor.u32 %v474_v48, %v470_v47  ;;  %v431_v3 = vrot.slane %v429_v54, 1  ;;  %v540_v12 = vrot.slane %v1693_v60, 1  ;;  %v1617_v15 = vld [vmem:[%s2247_s14 + $0x54] sm:$0xf]  ;;  %v2519_v16 = vld [vmem:[%s2247_s14 + $0x58] sm:$0xf] }
  0x4d   : > { %868 = vrot.lane.b32.xlu1 %v1724_v8, %s2140_s6  ;;  %v1664_v8 = vld [vmem:[%s2247_s14 + $0x24] sm:$0xe]  ;;  %v1249_v47 = vsel %vm1247_vm2, %v2038_v37, 0  ;;  %v722_v48 = vshll.u32 %v2551_v41, 16 }
  0x4e   : > { %860 = vrot.lane.b32.xlu0 %v1720_v24, %s2140_s6  ;;  %v462_v24 = vrot.slane %v460_v62, 1  ;;  %v1736_v32 = vcombine.low %v1664_v8, %v2393_v19  ;;  %v424_v19 = vshll.u32 %v2475_v29, 16  ;;  %v2525_v8 = vld [vmem:[%s2247_s14 + $0x28] sm:$0xf]  ;;  %1856 = vmatpush3.bf16.msra.mxu0 %v1249_v47 }
  0x4f   : > { %v1697_v26 = vcombine.low %v1609_v56, %v2525_v8  ;;  %v2569_v54 = vld [vmem:[%s2247_s14 + $0x38] ss:$0 sps:$4 sm:$0x11]   ;;  %1880 = vmatpush3.bf16.msra.mxu1 %v1249_v47  ;;  %1857 = vmatprep.subr.bf16.mxu0 %v2039_v43 }
  0x50   : > { %v463_v35 = vor.u32 %v462_v24, %v458_v22  ;;  %v1037_v44 = vrot.slane %v1736_v32, 1  ;;  %v426_v11 = vrot.slane %v424_v19, 1  ;;  %v544_v24 = vrot.slane %v2483_v36, 1  ;;  %1878 = vmatprep.subr.bf16.mxu1 %v2039_v43 }
  0x51   : > { %1002 = vrot.lane.b32.xlu1 %v957_v59, %s2141_s8  ;;  %v479_v59 = vrot.slane %v477_v49, 1  ;;  %v532_v32 = vrot.slane %v2488_v13, 1  ;;  %v1702_v36 = vcombine.low %v1619_v28, %v2535_v10  ;;  %v669_v17 = vshll.u32 %v1697_v26, 16  ;;  %v2595_v28 = vld [vmem:[%s2247_s14 + $0x64] sm:$0xf] }
  0x52   : > { %994 = vrot.lane.b32.xlu0 %v909_v0, %s2141_s8  ;;  %v468_v46 = vsel %vm384_vm1, %v463_v35, %v467_v2  ;;  %v1039_v62 = vsel %vm521_vm0, %v1037_v44, %v1038_v45  ;;  %v427_v0 = vor.u32 %v426_v11, %v422_v1  ;;  %v1611_v2 = vld [vmem:[%s2247_s14 + $0x30] sm:$0xf]  ;;  %v667_v49 = vshrl.u32 %v1697_v26, 16  ;;  %1858 = vmatpush3.bf16.msra.mxu0 %v2039_v43 }
  0x53   : > { %v480_v39 = vsel %vm384_vm1, %v475_v58, %v479_v59  ;;  %v533_v13 = vsel %vm521_vm0, %v531_v30, %v532_v32  ;;  %v729_v44 = vshll.u32 %v1702_v36, 16  ;;  %v671_v51 = vrot.slane %v669_v17, 1  ;;  %1881 = vmatpush3.bf16.msra.mxu1 %v2039_v43  ;;  %1859 = vmatprep.subr.bf16.mxu0 %v2040_v34 }
  0x54   : > { %v432_v20 = vsel %vm384_vm1, %v427_v0, %v431_v3  ;;  %v674_v11 = vshll.u32 %v2556_v42, 16  ;;  %v727_v58 = vshrl.u32 %v1702_v36, 16  ;;  %v724_v59 = vrot.slane %v722_v48, 1  ;;  %v1635_v0 = vld [vmem:[%s2247_s14 + $0x54] sm:$0xe]  ;;  %1879 = vmatprep.subr.bf16.mxu1 %v2040_v34 }
  0x55   : > { %1004 = vrot.lane.b32.xlu1 %v969_v14, %s2141_s8  ;;  %v1694_v14 = vcombine.low %v247_v6, %v2453_v57  ;;  %v542_v57 = vsel %vm521_vm0, %v540_v12, %v541_v7  ;;  %v672_v60 = vor.u32 %v671_v51, %v667_v49  ;;  %v731_v61 = vrot.slane %v729_v44, 1  ;;  %v1645_v44 = vld [vmem:[%s2247_s14 + $0x3c] sm:$0xf]  ;;  %v2034_v51 = vld [vmem:[%s2247_s14 + $0x68] ss:$0 sps:$4 sm:$0x11]  }
  0x56   : > { %996 = vrot.lane.b32.xlu0 %v921_v21, %s2141_s8  ;;  %v1701_v21 = vcombine.low %v1617_v15, %v2519_v16  ;;  %v676_v3 = vrot.slane %v674_v11, 1  ;;  %v686_v7 = vshll.u32 %v2569_v54, 16  ;;  %v1713_v15 = vcombine.low %v1631_v9, %v2525_v8  ;;  %1860 = vmatpush3.bf16.msra.mxu0 %v2040_v34  ;;  %v2035_v11 = vld [vmem:[%s2247_s14 + $0x38] ss:$0 sps:$4 sm:$0x11]  }
  0x57   : > { %v543_v22 = vrot.slane %v1694_v14, 1  ;;  %v732_v40 = vor.u32 %v731_v61, %v727_v58  ;;  %1882 = vmatpush3.bf16.msra.mxu1 %v2040_v34  ;;  %v797_v8 = vrot.slane %v2551_v41, 1  ;;  %v1653_v41 = vld [vmem:[%s2247_s14 + $0x6c] sm:$0xf]  ;;  %v788_v43 = vrot.slane %v2569_v54, 1 }
  0x58   : > { %v717_v35 = vshll.u32 %v1701_v21, 16  ;;  %v715_v45 = vshrl.u32 %v1701_v21, 16  ;;  %v677_v4 = vsel %vm384_vm1, %v672_v60, %v676_v3  ;;  %v784_v32 = vrot.slane %v1713_v15, 1  ;;  %v2036_v61 = vld [vmem:[%s2247_s14 + $0x74] ss:$0 sps:$4 sm:$0x11]  }
  0x59   : > { %1066 = vrot.lane.b32.xlu1 %v1048_v33, %s2142_s9  ;;  %v2541_v33 = vld [vmem:[%s2247_s14 + $0x34] sm:$0xf]  ;;  %v978_v58 = vshll.u32 %v2034_v51, 16  ;;  %v2037_v3 = vld [vmem:[%s2247_s14 + $0x44] ss:$0 sps:$4 sm:$0x11]  }
  0x5a   : > { %1058 = vrot.lane.b32.xlu0 %v1036_v5, %s2142_s9  ;;  %v545_v5 = vsel %vm521_vm0, %v543_v22, %v544_v24  ;;  %v1698_v19 = vcombine.low %v1611_v2, %v2541_v33  ;;  %v1643_v2 = vld [vmem:[%s2247_s14 + $0x30] sm:$0xf] }
  0x5c   : > { %v681_v1 = vshll.u32 %v1698_v19, 16  ;;  %v679_v6 = vshrl.u32 %v1698_v19, 16 }
  0x5d   : > { %493 = vrot.lane.b32.xlu1 %v468_v46, %s2137_s27  ;;  %v719_v46 = vrot.slane %v717_v35, 1  ;;  %v2602_v35 = vld [vmem:[%s2247_s14 + $0x34] sm:$0xf] }
  0x5e   : > { %485 = vrot.lane.b32.xlu0 %v420_v52, %s2137_s27  ;;  %v2565_v52 = vld [vmem:[%s2247_s14 + $0x68] ss:$0 sps:$4 sm:$0x11]   ;;  %v683_v63 = vrot.slane %v681_v1, 1  ;;  %v1721_v17 = vcombine.low %v1643_v2, %v2602_v35 }
  0x60   : > { %v684_v56 = vor.u32 %v683_v63, %v679_v6  ;;  %v925_v49 = vshll.u32 %v1721_v17, 16 }
  0x61   : > { %1068 = vrot.lane.b32.xlu1 %v1051_v55, %s2142_s9  ;;  %v720_v55 = vor.u32 %v719_v46, %v715_v45  ;;  %v2618_v45 = vld [vmem:[%s2247_s14 + $0x40] sm:$0xf] }
  0x62   : > { %1060 = vrot.lane.b32.xlu0 %v1039_v62, %s2142_s9  ;;  %v734_v62 = vshll.u32 %v2565_v52, 16  ;;  %v1722_v1 = vcombine.low %v1645_v44, %v2618_v45  ;;  %v927_v60 = vrot.slane %v925_v49, 1 }
  0x63   : > { %v725_v12 = vsel %vm384_vm1, %v720_v55, %v724_v59  ;;  %v923_v59 = vshrl.u32 %v1721_v17, 16 }
  0x64   : > { %v736_v14 = vrot.slane %v734_v62, 1  ;;  %v937_v62 = vshll.u32 %v1722_v1, 16  ;;  %v935_v15 = vshrl.u32 %v1722_v1, 16 }
  0x65   : > { %495 = vrot.lane.b32.xlu1 %v480_v39, %s2137_s27  ;;  %v1717_v39 = vcombine.low %v1635_v0, %v2519_v16  ;;  %v1632_v16 = vld [vmem:[%s2247_s14 + $0x30] sm:$0xe]  ;;  %v930_v0 = vshll.u32 %v2035_v11, 16  ;;  %v928_v9 = vor.u32 %v927_v60, %v923_v59 }
  0x66   : > { %487 = vrot.lane.b32.xlu0 %v432_v20, %s2137_s27  ;;  %v1636_v20 = vld [vmem:[%s2247_s14 + $0x60] sm:$0xe]  ;;  %v737_v22 = vsel %vm384_vm1, %v732_v40, %v736_v14 }
  0x67   : > { %v796_v24 = vrot.slane %v1717_v39, 1  ;;  %v1669_v40 = vld [vmem:[%s2247_s14 + $0x60] sm:$0xe]  ;;  %v932_v14 = vrot.slane %v930_v0, 1 }
  0x69   : > { %558 = vrot.lane.b32.xlu1 %v542_v57, %s2136_s24  ;;  %v1718_v57 = vcombine.low %v1636_v20, %v2535_v10  ;;  %v785_v10 = vrot.slane %v2556_v42, 1  ;;  %v798_v37 = vsel %vm521_vm0, %v796_v24, %v797_v8  ;;  %v939_v20 = vrot.slane %v937_v62, 1  ;;  %v1670_v8 = vld [vmem:[%s2247_s14 + $0x6c] sm:$0xe] }
  0x6a   : > { %550 = vrot.lane.b32.xlu0 %v530_v27, %s2136_s24  ;;  %v1714_v27 = vcombine.low %v1632_v16, %v2541_v33  ;;  %v800_v33 = vrot.slane %v2565_v52, 1 }
  0x6c   : > { %v787_v42 = vrot.slane %v1714_v27, 1 }
  0x6d   : > { %560 = vrot.lane.b32.xlu1 %v545_v5, %s2136_s24  ;;  %v799_v5 = vrot.slane %v1718_v57, 1 }
  0x6e   : > { %552 = vrot.lane.b32.xlu0 %v533_v13, %s2136_s24  ;;  %v2612_v13 = vld [vmem:[%s2247_s14 + $0x70] sm:$0xf]  ;;  %v789_v52 = vsel %vm521_vm0, %v787_v42, %v788_v43  ;;  %v1056_v43 = vrot.slane %v2036_v61, 1 }
  0x6f   : > { %v1726_v47 = vcombine.low %v1653_v41, %v2612_v13  ;;  %v801_v48 = vsel %vm521_vm0, %v799_v5, %v800_v33  ;;  %v1053_v5 = vrot.slane %v2034_v51, 1  ;;  %v1041_v41 = vrot.slane %v2035_v11, 1 }
  0x71   : > { %614 = vrot.lane.b32.xlu1 %v1701_v21, %s2135_s23  ;;  %v688_v21 = vrot.slane %v686_v7, 1  ;;  %v985_v54 = vshll.u32 %v1726_v47, 16  ;;  %v983_v63 = vshrl.u32 %v1726_v47, 16  ;;  %v980_v7 = vrot.slane %v978_v58, 1 }
  0x72   : > { %606 = vrot.lane.b32.xlu0 %v1697_v26, %s2135_s23  ;;  %v1651_v26 = vld [vmem:[%s2247_s14 + $0x60] sm:$0xf] }
  0x73   : > { %v689_v30 = vsel %vm384_vm1, %v684_v56, %v688_v21  ;;  %v987_v39 = vrot.slane %v985_v54, 1  ;;  %v1665_v56 = vld [vmem:[%s2247_s14 + $0x30] sm:$0xe]  ;;  %v1741_v21 = vcombine.low %v1669_v40, %v2595_v28 }
  0x74   : > { %v1737_v24 = vcombine.low %v1665_v56, %v2602_v35 }
  0x75   : > { %616 = vrot.lane.b32.xlu1 %v1702_v36, %s2135_s23  ;;  %v1725_v36 = vcombine.low %v1651_v26, %v2595_v28  ;;  %v988_v57 = vor.u32 %v987_v39, %v983_v63  ;;  %v933_v26 = vsel %vm384_vm1, %v928_v9, %v932_v14  ;;  %v1742_v28 = vcombine.low %v1670_v8, %v2612_v13 }
  0x76   : > { %608 = vrot.lane.b32.xlu0 %v1698_v19, %s2135_s23  ;;  %v786_v19 = vsel %vm521_vm0, %v784_v32, %v785_v10  ;;  %v1666_v10 = vld [vmem:[%s2247_s14 + $0x3c] sm:$0xe] }
  0x77   : > { %v973_v46 = vshll.u32 %v1725_v36, 16  ;;  %v971_v34 = vshrl.u32 %v1725_v36, 16  ;;  %v1738_v35 = vcombine.low %v1666_v10, %v2618_v45  ;;  %v1055_v13 = vrot.slane %v1742_v28, 1 }
  0x79   : > { %750 = vrot.lane.b32.xlu1 %v725_v12, %s2138_s30  ;;  %v975_v55 = vrot.slane %v973_v46, 1  ;;  %v990_v12 = vshll.u32 %v2036_v61, 16  ;;  %v1057_v49 = vsel %vm521_vm0, %v1055_v13, %v1056_v43 }
  0x7a   : > { %742 = vrot.lane.b32.xlu0 %v677_v4, %s2138_s30  ;;  %v942_v4 = vshll.u32 %v2037_v3, 16 }
  0x7b   : > { %v976_v6 = vor.u32 %v975_v55, %v971_v34 }
  0x7c   : > { %v944_v32 = vrot.slane %v942_v4, 1 }
  0x7d   : > { %752 = vrot.lane.b32.xlu1 %v737_v22, %s2138_s30  ;;  %v981_v16 = vsel %vm384_vm1, %v976_v6, %v980_v7  ;;  %v992_v22 = vrot.slane %v990_v12, 1 }
  0x7e   : > { %744 = vrot.lane.b32.xlu0 %v689_v30, %s2138_s30  ;;  %v940_v30 = vor.u32 %v939_v20, %v935_v15  ;;  %s2143_s30 = smov [#allocation2]  }
  0x80   : > { %v945_v33 = vsel %vm384_vm1, %v940_v30, %v944_v32 }
  0x81   : > { %814 = vrot.lane.b32.xlu1 %v798_v37, %s2139_s5  ;;  %v1052_v37 = vrot.slane %v1741_v21, 1 }
  0x82   : > { %806 = vrot.lane.b32.xlu0 %v786_v19, %s2139_s5 }
  0x83   : > { %v1054_v42 = vsel %vm521_vm0, %v1052_v37, %v1053_v5 }
  0x85   : > { %816 = vrot.lane.b32.xlu1 %v801_v48, %s2139_s5  ;;  %v1044_v48 = vrot.slane %v2037_v3, 1 }
  0x86   : > { %808 = vrot.lane.b32.xlu0 %v789_v52, %s2139_s5  ;;  %s202_s5 = sand.u32 1, %s2109_s16  }
  0x87   : > { %s2810_s23 = scalar_lea.sflag [#allocation3], %s202_s5 }
  0x89   : > { %870 = vrot.lane.b32.xlu1 %v1725_v36, %s2140_s6  ;;  %v993_v36 = vsel %vm384_vm1, %v988_v57, %v992_v22 }
  0x8a   : > { %862 = vrot.lane.b32.xlu0 %v1721_v17, %s2140_s6  ;;  %v1040_v17 = vrot.slane %v1737_v24, 1 }
  0x8c   : > { %v1042_v46 = vsel %vm521_vm0, %v1040_v17, %v1041_v41 }
  0x8d   : > { %872 = vrot.lane.b32.xlu1 %v1726_v47, %s2140_s6  ;;  %v1043_v47 = vrot.slane %v1738_v35, 1 }
  0x8e   : > { %864 = vrot.lane.b32.xlu0 %v1722_v1, %s2140_s6  ;;  %s1598_s6 = sshll.u32 %s202_s5, 6 }
  0x8f   : > { %v1045_v51 = vsel %vm521_vm0, %v1043_v47, %v1044_v48 }
  0x91   : > { %v2643_v27 = vpop.permute.xlu1 %610  ;;  %1006 = vrot.lane.b32.xlu1 %v981_v16, %s2141_s8 }
  0x92   : > { %v603_v2 = vpop.permute.xlu0 %602  ;;  %998 = vrot.lane.b32.xlu0 %v933_v26, %s2141_s8 }
  0x95   : > { %1008 = vrot.lane.b32.xlu1 %v993_v36, %s2141_s8 }
  0x96   : > { %v555_v19 = vpop.permute.xlu1 %554  ;;  %1000 = vrot.lane.b32.xlu0 %v945_v33, %s2141_s8  ;;  %s2772_s8 = scalar_lea.vmem [#allocation2], %s1598_s6  ;;  %s2045_s6 = sshll.u32 %s2143_s30, 4  ;;  %s2046_s6 = int_to_ptr.vmem [resolvable:$false] %s2045_s6 }
  0x97   : > { %v547_v44 = vpop.permute.xlu0 %546  ;;  %s1507_s13 = sshll.u32 %s2772_s8, 4  ;;  %s2804_s13 = int_to_ptr.vmem [resolvable:$true] %s1507_s13 }
  0x98   : > { %s2041_s24 = scalar_lea.vmem %s2804_s13, 1024  ;;  %p2048_p2 = scmp.lt.s32.totalorder %s2804_s13, %s2046_s6 }
  0x99   : > { %1070 = vrot.lane.b32.xlu1 %v1054_v42, %s2142_s9  ;;  %p2042_p13 = scmp.ne.s32.totalorder %s2804_s13, %s2041_s24 }
  0x9a   : > { %v557_v45 = vpop.permute.xlu1 %556  ;;  %1062 = vrot.lane.b32.xlu0 %v1042_v46, %s2142_s9 }
  0x9b   : > { %p2043_p0 = pnand %p2042_p13, %p2221_p3 }
  0x9c   : > { %v549_v52 = vpop.permute.xlu0 %548 }
  0x9d   : > { %1072 = vrot.lane.b32.xlu1 %v1057_v49, %s2142_s9  ;;  %p2044_p1 = pneg %p2043_p0 }
  0x9e   : > { %1064 = vrot.lane.b32.xlu0 %v1045_v51, %s2142_s9  ;;  %s1796_s9 = sshll.u32 %s2117_s18, 4 }
  0x9f   : > { %v484_v1 = vpop.permute.xlu1 %483  ;;  %s1504_s18 = sadd.s32 %s1796_s9, %s1775_s12  ;;  %s2047_s9 = scalar_lea.vmem %s2046_s6, 2048 }
  0xa0   : > { %v482_v11 = vpop.permute.xlu0 %481  ;;  %s1776_s19 = sshll.u32 %s1504_s18, 6  ;;  %p2049_p4 = scmp.lt.s32.totalorder %s2047_s9, %s2041_s24 }
  0xa1   : > { %v1076_v14 = vsel %vm1074_vm3, %v2284_v23, %v482_v11  ;;  %s2801_s14 = scalar_lea.hbm %s2866_s4, %s1776_s19 }
  0xa2   : > { %v1093_v56 = vsel %vm1091_vm4, %v1076_v14, %v547_v44  ;;  %p2050_p5 = por %p2049_p4, %p2048_p2 }
  0xa3   : > { %v492_v54 = vpop.permute.xlu1 %491  ;;  %v1110_v57 = vsel %vm1108_vm5, %v1093_v56, %v603_v2  ;;  %v1078_v2 = vsel %vm1074_vm3, %v2297_v38, %v484_v1 }
  0xa4   : > { %v490_v34 = vpop.permute.xlu0 %489  ;;  %v1095_v33 = vsel %vm1091_vm4, %v1078_v2, %v549_v52  ;;  %p2051_p6 = pnand %p2050_p5, %p2044_p1 }
  0xa5   : > { %v1084_v40 = vsel %vm1074_vm3, %v2279_v18, %v490_v34 }
  0xa6   : > { %v1101_v20 = vsel %vm1091_vm4, %v1084_v40, %v555_v19 }
  0xa7   : > { %v613_v55 = vpop.permute.xlu1 %612  ;;  %v1118_v21 = vsel %vm1108_vm5, %v1101_v20, %v2643_v27  ;;  %v1086_v27 = vsel %vm1074_vm3, %v2291_v31, %v492_v54 }
  0xa8   : > { %v605_v58 = vpop.permute.xlu0 %604  ;;  %v1103_v35 = vsel %vm1091_vm4, %v1086_v27, %v557_v45 }
  0xa9   : > { %v1120_v31 = vsel %vm1108_vm5, %v1103_v35, %v613_v55  ;;  %v1112_v38 = vsel %vm1108_vm5, %v1095_v33, %v605_v58 }
  0xab   : > { %v747_v59 = vpop.permute.xlu1 %746 }
  0xac   : > { %v739_v60 = vpop.permute.xlu0 %738  ;;  %v1135_v18 = vsel %vm1125_vm6, %v1118_v21, %v747_v59 }
  0xad   : > { %v1127_v22 = vsel %vm1125_vm6, %v1110_v57, %v739_v60 }
  0xaf   : > { %v749_v61 = vpop.permute.xlu1 %748 }
  0xb0   : > { %v741_v62 = vpop.permute.xlu0 %740  ;;  %v1137_v41 = vsel %vm1125_vm6, %v1120_v31, %v749_v61 }
  0xb1   : > { %v1129_v42 = vsel %vm1125_vm6, %v1112_v38, %v741_v62 }
  0xb3   : > { %v811_v0 = vpop.permute.xlu1 %810 }
  0xb4   : > { %v803_v3 = vpop.permute.xlu0 %802  ;;  %v1152_v24 = vsel %vm1142_vm7, %v1135_v18, %v811_v0 }
  0xb5   : > { %v1144_v8 = vsel %vm1142_vm7, %v1127_v22, %v803_v3 }
  0xb7   : > { %v813_v6 = vpop.permute.xlu1 %812 }
  0xb8   : > { %v805_v63 = vpop.permute.xlu0 %804  ;;  %v1154_v13 = vsel %vm1142_vm7, %v1137_v41, %v813_v6 }
  0xb9   : > { %v1146_v43 = vsel %vm1142_vm7, %v1129_v42, %v805_v63 }
  0xbb   : > { %v867_v7 = vpop.permute.xlu1 %866 }
  0xbc   : > { %v859_v9 = vpop.permute.xlu0 %858  ;;  %v1169_v26 = vsel %vm1159_vm8, %v1152_v24, %v867_v7 }
  0xbd   : > { %v1161_v30 = vsel %vm1159_vm8, %v1144_v8, %v859_v9 }
  0xbf   : > { %v869_v39 = vpop.permute.xlu1 %868 }
  0xc0   : > { %v861_v12 = vpop.permute.xlu0 %860  ;;  %v1171_v44 = vsel %vm1159_vm8, %v1154_v13, %v869_v39 }
  0xc1   : > { %v1163_v46 = vsel %vm1159_vm8, %v1146_v43, %v861_v12 }
  0xc3   : > { %v1003_v15 = vpop.permute.xlu1 %1002 }
  0xc4   : > { %v995_v4 = vpop.permute.xlu0 %994  ;;  %v1186_v32 = vsel %vm1176_vm9, %v1169_v26, %v1003_v15 }
  0xc5   : > { %v1178_v28 = vsel %vm1176_vm9, %v1161_v30, %v995_v4 }
  0xc7   : > { %v1005_v16 = vpop.permute.xlu1 %1004 }
  0xc8   : > { %v997_v23 = vpop.permute.xlu0 %996  ;;  %v1188_v47 = vsel %vm1176_vm9, %v1171_v44, %v1005_v16 }
  0xc9   : > { %v1180_v45 = vsel %vm1176_vm9, %v1163_v46, %v997_v23 }
  0xcb   : > { %v1067_v10 = vpop.permute.xlu1 %1066 }
  0xcc   : > { %v1059_v36 = vpop.permute.xlu0 %1058  ;;  %v1203_v37 = vsel %vm1193_vm10, %v1186_v32, %v1067_v10 }
  0xcd   : > { %v1195_v5 = vsel %vm1193_vm10, %v1178_v28, %v1059_v36  ;;  %1869 = vmatprep.mubr.msk.bf16.mxu1 %vm1230_vm11, %v1203_v37 }
  0xce   : > { %1861 = vmatprep.mubr.msk.bf16.mxu0 %vm1230_vm11, %v1195_v5 }
  0xcf   : > { %v494_v17 = vpop.permute.xlu1 %493 }
  0xd0   : > { %v486_v19 = vpop.permute.xlu0 %485  ;;  %v1088_v54 = vsel %vm1074_vm3, %v2432_v50, %v494_v17 }
  0xd1   : > { %v1080_v55 = vsel %vm1074_vm3, %v2435_v53, %v486_v19 }
  0xd3   : > { %v1069_v48 = vpop.permute.xlu1 %1068 }
  0xd4   : > { %v1205_v49 = vsel %vm1193_vm10, %v1188_v47, %v1069_v48  ;;  %v1061_v51 = vpop.permute.xlu0 %1060 }
  0xd5   : > { %v1197_v52 = vsel %vm1193_vm10, %v1180_v45, %v1061_v51  ;;  %1870 = vmatmul.mubr.msk.bf16.vlgmr.msra.gmra.mxu1 %vm1230_vm11, %v1205_v49  ;;  %v2746_v51 = vld [vmem:[%s2864_s2] ss:$0 sm:$0xff] }
  0xd6   : > { %1862 = vmatmul.mubr.msk.bf16.vlgmr.msra.gmra.mxu0 %vm1230_vm11, %v1197_v52 }
  0xd7   : > { %v496_v1 = vpop.permute.xlu1 %495 }
  0xd8   : > { %v488_v11 = vpop.permute.xlu0 %487  ;;  %v1090_v61 = vsel %vm1074_vm3, %v2470_v25, %v496_v1 }
  0xd9   : > { %v1082_v0 = vsel %vm1074_vm3, %v2475_v29, %v488_v11 }
  0xdb   : > { %v559_v34 = vpop.permute.xlu1 %558 }
  0xdc   : > { %v1105_v58 = vsel %vm1091_vm4, %v1088_v54, %v559_v34  ;;  %v551_v59 = vpop.permute.xlu0 %550  ;;  %v2753_v34 = vld [vmem:[%s2865_s3] ss:$0 sm:$0xff] }
  0xdd   : > { %v1097_v60 = vsel %vm1091_vm4, %v1080_v55, %v551_v59 }
  0xdf   : > { %v561_v62 = vpop.permute.xlu1 %560 }
  0xe0   : > { %v1107_v3 = vsel %vm1091_vm4, %v1090_v61, %v561_v62  ;;  %v553_v6 = vpop.permute.xlu0 %552 }
  0xe1   : > { %v1099_v50 = vsel %vm1091_vm4, %v1082_v0, %v553_v6 }
  0xe3   : > { %v615_v63 = vpop.permute.xlu1 %614 }
  0xe4   : > { %v607_v7 = vpop.permute.xlu0 %606  ;;  %v1122_v23 = vsel %vm1108_vm5, %v1105_v58, %v615_v63 }
  0xe5   : > { %v1114_v24 = vsel %vm1108_vm5, %v1097_v60, %v607_v7 }
  0xe7   : > { %v617_v53 = vpop.permute.xlu1 %616 }
  0xe8   : > { %v609_v9 = vpop.permute.xlu0 %608  ;;  %v1124_v2 = vsel %vm1108_vm5, %v1107_v3, %v617_v53 }
  0xe9   : > { %v1116_v5 = vsel %vm1108_vm5, %v1099_v50, %v609_v9 }
  0xeb   : > { %v751_v39 = vpop.permute.xlu1 %750 }
  0xec   : > { %v743_v12 = vpop.permute.xlu0 %742  ;;  %v1139_v8 = vsel %vm1125_vm6, %v1122_v23, %v751_v39 }
  0xed   : > { %v1131_v27 = vsel %vm1125_vm6, %v1114_v24, %v743_v12 }
  0xef   : > { %v753_v40 = vpop.permute.xlu1 %752 }
  0xf0   : > { %v745_v14 = vpop.permute.xlu0 %744  ;;  %v1141_v35 = vsel %vm1125_vm6, %v1124_v2, %v753_v40 }
  0xf1   : > { %v1133_v38 = vsel %vm1125_vm6, %v1116_v5, %v745_v14 }
  0xf3   : > { %v815_v15 = vpop.permute.xlu1 %814 }
  0xf4   : > { %v807_v20 = vpop.permute.xlu0 %806  ;;  %v1156_v30 = vsel %vm1142_vm7, %v1139_v8, %v815_v15 }
  0xf5   : > { %v1148_v32 = vsel %vm1142_vm7, %v1131_v27, %v807_v20 }
  0xf7   : > { %v817_v25 = vpop.permute.xlu1 %816 }
  0xf8   : > { %v809_v4 = vpop.permute.xlu0 %808  ;;  %v1158_v41 = vsel %vm1142_vm7, %v1141_v35, %v817_v25 }
  0xf9   : > { %v1150_v42 = vsel %vm1142_vm7, %v1133_v38, %v809_v4 }
  0xfb   : > { %v871_v56 = vpop.permute.xlu1 %870 }
  0xfc   : > { %v863_v21 = vpop.permute.xlu0 %862  ;;  %v1173_v10 = vsel %vm1159_vm8, %v1156_v30, %v871_v56 }
  0xfd   : > { %v1165_v28 = vsel %vm1159_vm8, %v1148_v32, %v863_v21 }
  0xff   : > { %v873_v29 = vpop.permute.xlu1 %872 }
 0x100   : > { %v865_v16 = vpop.permute.xlu0 %864  ;;  %v1175_v13 = vsel %vm1159_vm8, %v1158_v41, %v873_v29 }
 0x101   : > { %v1167_v43 = vsel %vm1159_vm8, %v1150_v42, %v865_v16 }
 0x103   : > { %v1007_v18 = vpop.permute.xlu1 %1006 }
 0x104   : > { %v999_v57 = vpop.permute.xlu0 %998  ;;  %v1190_v36 = vsel %vm1176_vm9, %v1173_v10, %v1007_v18 }
 0x105   : > { %v1182_v31 = vsel %vm1176_vm9, %v1165_v28, %v999_v57 }
 0x107   : > { %v1009_v22 = vpop.permute.xlu1 %1008 }
 0x108   : > { %v1001_v26 = vpop.permute.xlu0 %1000  ;;  %v1192_v44 = vsel %vm1176_vm9, %v1175_v13, %v1009_v22 }
 0x109   : > { %v1184_v47 = vsel %vm1176_vm9, %v1167_v43, %v1001_v26 }
 0x10b   : > { %v1071_v37 = vpop.permute.xlu1 %1070 }
 0x10c   : > { %v1207_v33 = vsel %vm1193_vm10, %v1190_v36, %v1071_v37  ;;  %v1063_v17 = vpop.permute.xlu0 %1062 }
 0x10d   : > { %v1199_v19 = vsel %vm1193_vm10, %v1182_v31, %v1063_v17  ;;  %1873 = vmatprep.mubr.msk.bf16.mxu1 %vm1230_vm11, %v1207_v33 }
 0x10e   : > { %1865 = vmatprep.mubr.msk.bf16.mxu0 %vm1230_vm11, %v1199_v19 }
 0x10f   : > { %v1073_v46 = vpop.permute.xlu1 %1072 }
 0x110   : > { %v1209_v48 = vsel %vm1193_vm10, %v1192_v44, %v1073_v46  ;;  %v1065_v45 = vpop.permute.xlu0 %1064 }
 0x111   : > { %v1201_v49 = vsel %vm1193_vm10, %v1184_v47, %v1065_v45  ;;  %1874 = vmatmul.mubr.msk.bf16.gmra.mxu1 %vm1230_vm11, %v1209_v48 }
 0x112   : > { %1866 = vmatmul.mubr.msk.bf16.gmra.mxu0 %vm1230_vm11, %v1201_v49 }
 0x195   : > { %v1871_v52 = vpop.f32.mrf.mxu1 }
 0x196   : > { %v1863_v1 = vpop.f32.mrf.mxu0  ;;  %v1365_v11 = vmul.f32 %v1871_v52, %v2746_v51 }
 0x197   : > { %v1357_v54 = vmul.f32 %v1863_v1, %v2746_v51  ;;  %v1317_v55 = vpop.f32.mrf.mxu1 }
 0x198   : > { %v1285_v58 = vpop.f32.mrf.mxu0  ;;  %v1363_v59 = vmul.f32 %v2746_v51, %v1317_v55  ;;  %v1388_v62 = vadd.f32 %v2753_v34, %v1365_v11 }
 0x199   : > { %v1355_v60 = vmul.f32 %v2746_v51, %v1285_v58  ;;  %v1872_v61 = vpop.f32.mrf.mxu1  ;;  %v1380_v6 = vadd.f32 %v2753_v34, %v1357_v54 }
 0x19a   : > { %v1864_v0 = vpop.f32.mrf.mxu0  ;;  %v1366_v3 = vmul.f32 %v1872_v61, %v2746_v51  ;;  %v1386_v7 = vadd.f32 %v2753_v34, %v1363_v59  ;;  %v1404_v15 = vmax.f32 %v1388_v62, 0.0 }
 0x19b   : > { %v1358_v50 = vmul.f32 %v1864_v0, %v2746_v51  ;;  %v1320_v63 = vpop.f32.mrf.mxu1  ;;  %v1378_v12 = vadd.f32 %v2753_v34, %v1355_v60  ;;  %v1396_v4 = vmax.f32 %v1380_v6, 0.0 }
 0x19c   : > { %v1389_v53 = vadd.f32 %v2753_v34, %v1366_v3  ;;  %v1288_v9 = vpop.f32.mrf.mxu0  ;;  %v1364_v39 = vmul.f32 %v2746_v51, %v1320_v63  ;;  %v1402_v29 = vmax.f32 %v1386_v7, 0.0 }
 0x19d   : > { %v1381_v40 = vadd.f32 %v2753_v34, %v1358_v50  ;;  %v1356_v14 = vmul.f32 %v2746_v51, %v1288_v9  ;;  %v1394_v57 = vmax.f32 %v1378_v12, 0.0 }
 0x19e   : > { %v1405_v20 = vmax.f32 %v1389_v53, 0.0  ;;  %v1387_v25 = vadd.f32 %v2753_v34, %v1364_v39 }
 0x19f   : > { %v1397_v56 = vmax.f32 %v1381_v40, 0.0  ;;  %v1379_v21 = vadd.f32 %v2753_v34, %v1356_v14 }
 0x1a0   : > { %v1825_v16 = vpack.c.bf16 %v1405_v20, %v1404_v15  ;;  %v1403_v18 = vmax.f32 %v1387_v25, 0.0 }
 0x1a1   : > { %v1805_v23 = vpack.c.bf16 %v1397_v56, %v1396_v4  ;;  %v1395_v22 = vmax.f32 %v1379_v21, 0.0 }
 0x1a2   : > { %1841 = vst [vmem:[%s2772_s8 + $0x28] sm:$0xff] %v1825_v16   ;;  %v1820_v24 = vpack.c.bf16 %v1403_v18, %v1402_v29 }
 0x1a3   : > { %1837 = vst [vmem:[%s2772_s8 + $0x8] sm:$0xff] %v1805_v23   ;;  %v1800_v8 = vpack.c.bf16 %v1395_v22, %v1394_v57 }
 0x1a4   : > { %1840 = vst [vmem:[%s2772_s8 + $0x20] sm:$0xff] %v1820_v24  }
 0x1a5   : > { %1801 = vst [vmem:[%s2772_s8] sm:$0xff] %v1800_v8  }
 0x1d1   : > { %v1875_v26 = vpop.f32.mrf.mxu1 }
 0x1d2   : > { %v1867_v27 = vpop.f32.mrf.mxu0  ;;  %v1369_v30 = vmul.f32 %v1875_v26, %v2746_v51 }
 0x1d3   : > { %v1361_v32 = vmul.f32 %v1867_v27, %v2746_v51  ;;  %v1333_v10 = vpop.f32.mrf.mxu1 }
 0x1d4   : > { %v1301_v2 = vpop.f32.mrf.mxu0  ;;  %v1367_v28 = vmul.f32 %v2746_v51, %v1333_v10  ;;  %v1392_v5 = vadd.f32 %v2753_v34, %v1369_v30 }
 0x1d5   : > { %v1359_v36 = vmul.f32 %v2746_v51, %v1301_v2  ;;  %v1876_v37 = vpop.f32.mrf.mxu1  ;;  %v1384_v33 = vadd.f32 %v2753_v34, %v1361_v32 }
 0x1d6   : > { %v1868_v35 = vpop.f32.mrf.mxu0  ;;  %v1370_v31 = vmul.f32 %v1876_v37, %v2746_v51  ;;  %v1390_v41 = vadd.f32 %v2753_v34, %v1367_v28  ;;  %v1408_v47 = vmax.f32 %v1392_v5, 0.0 }
 0x1d7   : > { %v1362_v17 = vmul.f32 %v1868_v35, %v2746_v51  ;;  %v1336_v38 = vpop.f32.mrf.mxu1  ;;  %v1382_v43 = vadd.f32 %v2753_v34, %v1359_v36  ;;  %v1400_v49 = vmax.f32 %v1384_v33, 0.0 }
 0x1d8   : > { %v1393_v19 = vadd.f32 %v2753_v34, %v1370_v31  ;;  %v1304_v42 = vpop.f32.mrf.mxu0  ;;  %v1368_v13 = vmul.f32 %v2746_v51, %v1336_v38  ;;  %v1406_v11 = vmax.f32 %v1390_v41, 0.0 }
 0x1d9   : > { %v1385_v44 = vadd.f32 %v2753_v34, %v1362_v17  ;;  %v1360_v46 = vmul.f32 %v2746_v51, %v1304_v42  ;;  %v1398_v58 = vmax.f32 %v1382_v43, 0.0 }
 0x1da   : > { %v1409_v48 = vmax.f32 %v1393_v19, 0.0  ;;  %v1391_v45 = vadd.f32 %v2753_v34, %v1368_v13 }
 0x1db   : > { %v1401_v52 = vmax.f32 %v1385_v44, 0.0  ;;  %v1383_v1 = vadd.f32 %v2753_v34, %v1360_v46 }
 0x1dc   : > { %v1835_v54 = vpack.c.bf16 %v1409_v48, %v1408_v47  ;;  %v1407_v55 = vmax.f32 %v1391_v45, 0.0 }
 0x1dd   : > { %v1815_v51 = vpack.c.bf16 %v1401_v52, %v1400_v49  ;;  %v1399_v59 = vmax.f32 %v1383_v1, 0.0 }
 0x1de   : > { %1843 = vst [vmem:[%s2772_s8 + $0x38] sm:$0xff] %v1835_v54   ;;  %v1830_v60 = vpack.c.bf16 %v1407_v55, %v1406_v11 }
 0x1df   : > { %1839 = vst [vmem:[%s2772_s8 + $0x18] sm:$0xff] %v1815_v51   ;;  %v1810_v34 = vpack.c.bf16 %v1399_v59, %v1398_v58 }
 0x1e0   : > { %1842 = vst [vmem:[%s2772_s8 + $0x30] sm:$0xff] %v1830_v60  }
 0x1e1   : > { %1838 = vst [vmem:[%s2772_s8 + $0x10] sm:$0xff] %v1810_v34  }
 0x1e2   : > { %2054 = shalt.err (!%p2051_p6)
}
 0x1e3   : > { %s2055_s5 = scalar_lea.hbm %s2801_s14, 1024  ;;  %s2059_s18 = scalar_lea.hbm %s2866_s4, 4096 }
 0x1e4   : > { %p2056_p7 = scmp.ne.s32.totalorder %s2801_s14, %s2055_s5  ;;  %p2060_p11 = scmp.lt.s32.totalorder %s2801_s14, %s2866_s4 }
 0x1e5   : > { %p2061_p12 = scmp.lt.s32.totalorder %s2059_s18, %s2055_s5 }
 0x1e6   : > { %p2057_p9 = pnand %p2056_p7, %p2221_p3 }
 0x1e7   : > { %p2062_p13 = por %p2061_p12, %p2060_p11 }
 0x1e8   : > { %p2058_p10 = pneg %p2057_p9 }
 0x1ea   : > { %p2063_p0 = pnand %p2062_p13, %p2058_p10 }
 0x1ec   : > { %2066 = shalt.err (!%p2063_p0)
}
 0x1ed   : > { %s2144_s11 = smov 64  }
 0x1ee   : > { %1886 = dma.vmem_to_hbm [thread:$0]  (%p2221_p3), %s2804_s13, 1024, %s2801_s14, %s2810_s23, %s2144_s11, %s2144_s11, %s2137_s27  }
 0x1ef PF: > { %p1892_p1 = scmp.ge.s32.totalorder %s2133_s22, 2  ;;  %s1522_s24 = sand.u32 1, %s2105_s15  }
 0x1f0   : > { %s1523_s30 = scalar_lea.sflag [#allocation3], %s1522_s24 }
 0x1f1   : > { %p1889_p2 = pnand %p1892_p1, %p2230_p8 }
 0x1f3   : > { %p1890_p4 = pneg %p1889_p2 }
 0x1f5   : > { %2100 = dma.done.wait (%p1890_p4), %s1523_s30, 1024  }
 0x1f6   : > { %2102 = vsyncadd (%p1890_p4), %s1523_s30, 4294966272  ;;  %s17_s22 = sadd.s32 1, %s2133_s22   ;;  %s2869_s15 = smov %s2109_s16 }
 0x1f7   : > { %p14_p5 = scmp.ge.s32.totalorder %s17_s22, 6   ;;  %s2870_s16 = smov %s2113_s17 }
 0x1f8   : > { %s2871_s17 = smov %s2239_s7  ;;  %s2872_s18 = smov %s2125_s20 }
 0x1f9   : > { %s2873_s19 = smov %s2129_s21  ;;  %s2874_s20 = smov %s2877_s25 }
 0x1fa   : > { %s2875_s21 = smov %s2881_s26  ;;  %16 = sbr.rel (!%p14_p5) target bundleno = 5 (0x5), region = 74 }
 0x1ff   :  { %1528 = vsyncpa [#allocation3], 1 }
 0x200   :  { %1530 = vsyncpa [#allocation3 + $0x1], 1 }

</bundles_post_ra>
